<compile_context>
chip_gen: v7x
topology: tpu7x:2x2x1
jax: 0.10.0
libtpu: 0.0.40
codegen_flags: <defaults>
</compile_context>

<pallas_src>
import jax
import jax.numpy as jnp
from jax import lax
from jax.experimental import pallas as pl
from jax.experimental.pallas import tpu as pltpu

INPUT_DIM = 71   # X_scaled.shape[1] in the reference script (71 feature columns)
H1 = 128
H2 = 64
OUTPUT_DIM = 1


def _round_up(a, m):
    return ((a + m - 1) // m) * m


def make_mlp_kernel(tb, sub):
    """Build the fused kernel for a (tb, 71) batch tile, processed in `sub`-row
    sub-tiles via an unrolled inner loop."""
    assert tb % sub == 0
    n_sub = tb // sub

    def mlp_kernel(x_ref, w1_ref, b1_ref, w2_ref, b2_ref, w3_ref, b3_ref, o_ref):
        # Resident weights / biases: loaded once per grid step (constant block
        # indices keep them pinned in VMEM across the whole grid).
        w1 = w1_ref[...]          # (71, 128)   (bf16 or f32)
        b1 = b1_ref[...]          # (1, 128)    f32
        w2 = w2_ref[...]          # (128, 64)   (bf16 or f32)
        b2 = b2_ref[...]          # (1, 64)     f32
        w3 = w3_ref[...]          # (64, 1)     f32
        b3 = b3_ref[...]          # (1, 1)      f32

        def body(s, carry):
            r = pl.multiple_of(s * sub, sub)
            x = x_ref[pl.ds(r, sub), :]                                   # (sub, 71)

            # fc1 + ReLU: MXU matmul, f32 accumulation; bias/ReLU on the VPU in f32.
            h1 = jnp.dot(x, w1, preferred_element_type=jnp.float32) + b1
            h1 = jnp.maximum(h1, 0.0)                                     # (sub, 128) f32
            # dropout -> identity (inference)

            # fc2 + ReLU. Cast the MXU operand to the weight dtype (keeps MXU
            # inputs narrow on the bf16 path; no-op in the f32 path).
            h1 = h1.astype(w2.dtype)
            h2 = jnp.dot(h1, w2, preferred_element_type=jnp.float32) + b2
            h2 = jnp.maximum(h2, 0.0)                                     # (sub, 64) f32
            # dropout -> identity (inference)

            # fc3: N=1 MXU dot in f32 (same push cadence as N=128; avoids the
            # XLU lane-reduce + relayout of the previous version).
            out = jnp.dot(h2, w3, preferred_element_type=jnp.float32) + b3  # (sub, 1)
            o_ref[pl.ds(r, sub), :] = out.astype(o_ref.dtype)
            return carry

        lax.fori_loop(0, n_sub, body, 0, unroll=True)

    return mlp_kernel


def mlp_forward(x, params, *, block_b=2048, sub_b=256):
    """Fused MLP forward.  x: (B, 71) in f32 or bf16 -> (B, 1) f32.

    x is streamed in its incoming dtype: for best HBM bandwidth produce x in
    bf16 upstream (do NOT cast here -- a wrapper cast is an extra full pass
    over x in HBM).  w1/w2 may likewise be supplied in bf16; b*, w3 stay f32.
    """
    w1, b1, w2, b2, w3, b3 = params
    B = x.shape[0]

    # Batch tile: multiple of 8 (sublane), aims for >= 2 grid steps when B > 128
    # so the "parallel" batch axis shards across both v7x TensorCores, and never
    # exceeds the (8-rounded) batch so blocks never exceed the array extent.
    tb = min(block_b, max(128, _round_up(pl.cdiv(B, 2), 128)))
    tb = min(tb, _round_up(B, 8))
    num_tiles = pl.cdiv(B, tb)          # ragged last block; no wrapper-side pad

    # Sub-tile size for the unrolled inner loop (must divide tb).
    if tb % sub_b == 0:
        sub = sub_b
    elif tb % 128 == 0:
        sub = 128
    else:
        sub = tb

    out = pl.pallas_call(
        make_mlp_kernel(tb, sub),
        out_shape=jax.ShapeDtypeStruct((B, OUTPUT_DIM), jnp.float32),
        grid=(num_tiles,),
        in_specs=[
            pl.BlockSpec((tb, INPUT_DIM), lambda i: (i, 0)),   # x: streamed per tile
            pl.BlockSpec((INPUT_DIM, H1), lambda i: (0, 0)),   # w1: resident
            pl.BlockSpec((1, H1),         lambda i: (0, 0)),   # b1: resident
            pl.BlockSpec((H1, H2),        lambda i: (0, 0)),   # w2: resident
            pl.BlockSpec((1, H2),         lambda i: (0, 0)),   # b2: resident
            pl.BlockSpec((H2, OUTPUT_DIM), lambda i: (0, 0)),  # w3: resident
            pl.BlockSpec((1, OUTPUT_DIM), lambda i: (0, 0)),   # b3: resident
        ],
        out_specs=pl.BlockSpec((tb, OUTPUT_DIM), lambda i: (i, 0)),
        compiler_params=pltpu.CompilerParams(
            dimension_semantics=("parallel",),
        ),
    )(x, w1, b1, w2, b2, w3, b3)

    return out


def init_params(key):
    """Deterministic init mimicking PyTorch nn.Linear default:
    U(-1/sqrt(fan_in), 1/sqrt(fan_in)) for weight and bias.
    Weights stored as (in, out) = W^T."""
    def linear_init(k, fan_in, fan_out):
        kw, kb = jax.random.split(k)
        bound = 1.0 / jnp.sqrt(fan_in)
        w = jax.random.uniform(kw, (fan_in, fan_out), jnp.float32, -bound, bound)
        b = jax.random.uniform(kb, (1, fan_out), jnp.float32, -bound, bound)
        return w, b

    k1, k2, k3 = jax.random.split(key, 3)
    w1, b1 = linear_init(k1, INPUT_DIM, H1)
    w2, b2 = linear_init(k2, H1, H2)
    w3, b3 = linear_init(k3, H2, OUTPUT_DIM)
    return (w1, b1, w2, b2, w3, b3)


def reference_forward(x, params):
    w1, b1, w2, b2, w3, b3 = params
    h1 = jnp.maximum(x @ w1 + b1, 0.0)
    h2 = jnp.maximum(h1 @ w2 + b2, 0.0)
    return h2 @ w3 + b3


if __name__ == "__main__":
    key = jax.random.PRNGKey(0)
    kx, kx2, kp = jax.random.split(key, 3)
    params = init_params(kp)
    w1, b1, w2, b2, w3, b3 = params

    # --- small batch, f32 path (exact-ish vs reference) -----------------------
    B = 8
    x = jax.random.normal(kx, (B, INPUT_DIM), jnp.float32)
    ref = reference_forward(x, params)
    out = jax.block_until_ready(mlp_forward(x, params))
    assert out.shape == (B, OUTPUT_DIM)
    assert jnp.allclose(out, ref, atol=1e-4, rtol=1e-4), "f32 mismatch vs reference"

    # --- ragged multi-tile batch (exercises >=2 grid steps + clipped last block)
    B2 = 300
    x2 = jax.random.normal(kx2, (B2, INPUT_DIM), jnp.float32)
    ref2 = reference_forward(x2, params)
    out2 = jax.block_until_ready(mlp_forward(x2, params))
    assert out2.shape == (B2, OUTPUT_DIM)
    assert jnp.allclose(out2, ref2, atol=1e-4, rtol=1e-4), "ragged f32 mismatch vs reference"

    # --- bf16 MXU-operand path: x / w1 / w2 produced in bf16 UPSTREAM (no
    # wrapper-side cast), biases / w3 / accumulation stay f32 ------------------
    x_bf16 = x.astype(jnp.bfloat16)
    params_bf16 = (w1.astype(jnp.bfloat16), b1, w2.astype(jnp.bfloat16), b2, w3, b3)
    out_bf16 = jax.block_until_ready(mlp_forward(x_bf16, params_bf16))
    assert out_bf16.shape == (B, OUTPUT_DIM)
    assert jnp.allclose(out_bf16, ref, atol=1e-1, rtol=1e-1), "bf16 mismatch vs reference"

    print("KERNEL_OK")
</pallas_src>

<mosaic_0001>
module attributes {stable_mosaic.version = 11 : i64} {
  func.func @mlp_kernel(%arg0: i32, %arg1: memref<8x71xf32, #tpu.memory_space<vmem>>, %arg2: memref<71x128xf32, #tpu.memory_space<vmem>>, %arg3: memref<1x128xf32, #tpu.memory_space<vmem>>, %arg4: memref<128x64xf32, #tpu.memory_space<vmem>>, %arg5: memref<1x64xf32, #tpu.memory_space<vmem>>, %arg6: memref<64x1xf32, #tpu.memory_space<vmem>>, %arg7: memref<1x1xf32, #tpu.memory_space<vmem>>, %arg8: memref<8x1xf32, #tpu.memory_space<vmem>>) attributes {dimension_semantics = [#tpu.dimension_semantics<parallel>], iteration_bounds = array<i64: 1>, scalar_prefetch = 0 : i64, scratch_operands = 0 : i64, tpu.core_type = #tpu.core_type<tc>, window_params = [{transform_indices = @transform_0, window_bounds = array<i64: 8, 71>}, {pipeline_mode = #tpu.pipeline_mode<synchronous>, transform_indices = @transform_1, window_bounds = array<i64: 71, 128>}, {pipeline_mode = #tpu.pipeline_mode<synchronous>, transform_indices = @transform_2, window_bounds = array<i64: 1, 128>}, {pipeline_mode = #tpu.pipeline_mode<synchronous>, transform_indices = @transform_3, window_bounds = array<i64: 128, 64>}, {pipeline_mode = #tpu.pipeline_mode<synchronous>, transform_indices = @transform_4, window_bounds = array<i64: 1, 64>}, {pipeline_mode = #tpu.pipeline_mode<synchronous>, transform_indices = @transform_5, window_bounds = array<i64: 64, 1>}, {pipeline_mode = #tpu.pipeline_mode<synchronous>, transform_indices = @transform_6, window_bounds = array<i64: 1, 1>}, {transform_indices = @transform_7, window_bounds = array<i64: 8, 1>}]} {
    %c0 = arith.constant 0 : index
    %c0_0 = arith.constant 0 : index
    %0 = vector.load %arg2[%c0, %c0_0] : memref<71x128xf32, #tpu.memory_space<vmem>>, vector<71x128xf32>
    %c0_1 = arith.constant 0 : index
    %c0_2 = arith.constant 0 : index
    %1 = vector.load %arg3[%c0_1, %c0_2] : memref<1x128xf32, #tpu.memory_space<vmem>>, vector<1x128xf32>
    %c0_3 = arith.constant 0 : index
    %c0_4 = arith.constant 0 : index
    %2 = vector.load %arg4[%c0_3, %c0_4] : memref<128x64xf32, #tpu.memory_space<vmem>>, vector<128x64xf32>
    %c0_5 = arith.constant 0 : index
    %c0_6 = arith.constant 0 : index
    %3 = vector.load %arg5[%c0_5, %c0_6] : memref<1x64xf32, #tpu.memory_space<vmem>>, vector<1x64xf32>
    %c0_7 = arith.constant 0 : index
    %c0_8 = arith.constant 0 : index
    %4 = vector.load %arg6[%c0_7, %c0_8] : memref<64x1xf32, #tpu.memory_space<vmem>>, vector<64x1xf32>
    %c0_9 = arith.constant 0 : index
    %c0_10 = arith.constant 0 : index
    %5 = vector.load %arg7[%c0_9, %c0_10] : memref<1x1xf32, #tpu.memory_space<vmem>>, vector<1x1xf32>
    %c0_i32 = arith.constant 0 : i32
    %c8_i32 = arith.constant 8 : i32
    %6 = arith.muli %c0_i32, %c8_i32 : i32
    %7 = tpu.assume_multiple %6, 8 : i32
    %8 = arith.index_cast %7 : i32 to index
    %c0_11 = arith.constant 0 : index
    %9 = vector.load %arg1[%8, %c0_11] : memref<8x71xf32, #tpu.memory_space<vmem>>, vector<8x71xf32>
    %cst = arith.constant dense<0.000000e+00> : vector<8x128xf32>
    %10 = tpu.matmul %9, %0, %cst {dimension_numbers = #tpu.dot_dimension_numbers<[1], [0], [0], [1], [0, 0, 1, 1], [], []>} : vector<8x71xf32>, vector<71x128xf32>, vector<8x128xf32> -> vector<8x128xf32>
    %11 = vector.broadcast %1 : vector<1x128xf32> to vector<8x128xf32>
    %12 = arith.addf %10, %11 : vector<8x128xf32>
    %cst_12 = arith.constant 0.000000e+00 : f32
    %13 = vector.broadcast %cst_12 : f32 to vector<8x128xf32>
    %14 = arith.maximumf %12, %13 : vector<8x128xf32>
    %cst_13 = arith.constant dense<0.000000e+00> : vector<8x64xf32>
    %15 = tpu.matmul %14, %2, %cst_13 {dimension_numbers = #tpu.dot_dimension_numbers<[1], [0], [0], [1], [0, 0, 1, 1], [], []>} : vector<8x128xf32>, vector<128x64xf32>, vector<8x64xf32> -> vector<8x64xf32>
    %16 = vector.broadcast %3 : vector<1x64xf32> to vector<8x64xf32>
    %17 = arith.addf %15, %16 : vector<8x64xf32>
    %cst_14 = arith.constant 0.000000e+00 : f32
    %18 = vector.broadcast %cst_14 : f32 to vector<8x64xf32>
    %19 = arith.maximumf %17, %18 : vector<8x64xf32>
    %cst_15 = arith.constant dense<0.000000e+00> : vector<8x1xf32>
    %20 = tpu.matmul %19, %4, %cst_15 {dimension_numbers = #tpu.dot_dimension_numbers<[1], [0], [0], [1], [0, 0, 1, 1], [], []>} : vector<8x64xf32>, vector<64x1xf32>, vector<8x1xf32> -> vector<8x1xf32>
    %21 = vector.broadcast %5 : vector<1x1xf32> to vector<8x1xf32>
    %22 = arith.addf %20, %21 : vector<8x1xf32>
    %23 = arith.index_cast %7 : i32 to index
    %c0_16 = arith.constant 0 : index
    %24 = vector.load %arg8[%23, %c0_16] : memref<8x1xf32, #tpu.memory_space<vmem>>, vector<8x1xf32>
    tpu.vector_store %arg8[%23, %c0_16], %22 {strides = array<i32>} : memref<8x1xf32, #tpu.memory_space<vmem>>, vector<8x1xf32>,
    %c1_i32 = arith.constant 1 : i32
    return
  }
  func.func @transform_0(%arg0: i32) -> (i32, i32) {
    %c0_i32 = arith.constant 0 : i32
    %c0_i32_0 = arith.constant 0 : i32
    return %arg0, %c0_i32 : i32, i32
  }
  func.func @transform_1(%arg0: i32) -> (i32, i32) {
    %c0_i32 = arith.constant 0 : i32
    %c0_i32_0 = arith.constant 0 : i32
    %c0_i32_1 = arith.constant 0 : i32
    return %c0_i32, %c0_i32_0 : i32, i32
  }
  func.func @transform_2(%arg0: i32) -> (i32, i32) {
    %c0_i32 = arith.constant 0 : i32
    %c0_i32_0 = arith.constant 0 : i32
    %c0_i32_1 = arith.constant 0 : i32
    return %c0_i32, %c0_i32_0 : i32, i32
  }
  func.func @transform_3(%arg0: i32) -> (i32, i32) {
    %c0_i32 = arith.constant 0 : i32
    %c0_i32_0 = arith.constant 0 : i32
    %c0_i32_1 = arith.constant 0 : i32
    return %c0_i32, %c0_i32_0 : i32, i32
  }
  func.func @transform_4(%arg0: i32) -> (i32, i32) {
    %c0_i32 = arith.constant 0 : i32
    %c0_i32_0 = arith.constant 0 : i32
    %c0_i32_1 = arith.constant 0 : i32
    return %c0_i32, %c0_i32_0 : i32, i32
  }
  func.func @transform_5(%arg0: i32) -> (i32, i32) {
    %c0_i32 = arith.constant 0 : i32
    %c0_i32_0 = arith.constant 0 : i32
    %c0_i32_1 = arith.constant 0 : i32
    return %c0_i32, %c0_i32_0 : i32, i32
  }
  func.func @transform_6(%arg0: i32) -> (i32, i32) {
    %c0_i32 = arith.constant 0 : i32
    %c0_i32_0 = arith.constant 0 : i32
    %c0_i32_1 = arith.constant 0 : i32
    return %c0_i32, %c0_i32_0 : i32, i32
  }
  func.func @transform_7(%arg0: i32) -> (i32, i32) {
    %c0_i32 = arith.constant 0 : i32
    %c0_i32_0 = arith.constant 0 : i32
    return %arg0, %c0_i32 : i32, i32
  }
}

</mosaic_0001>

<bundles_post_ra>
// kernel: tpu_custom_call.1
= control target key start
LH: loop header
LB: loop body
LE: loop exit
PB: predicated region body
PF: predicated region fallthrough
CT: control target
= control target key end

     0   :  { %v481_v0 = vmov 0.0|0.0   ;;  %vm482_vm0 = vmmov 0   ;;  %v483_v4 = vmov 0.0   ;;  %vm75_vm1 = vcmask 1046528   ;;  %s657_s1 = inlined_call_operand.vmem [shape: f32[71,128], index: 1, kind: input, shape index: {}]   ;;  %s658_s3 = inlined_call_operand.vmem [shape: f32[128,64], index: 3, kind: input, shape index: {}]   ;;  %s659_s0 = inlined_call_operand.vmem [shape: f32[8,71], index: 0, kind: input, shape index: {}]   ;;  %s660_s5 = inlined_call_operand.vmem [shape: f32[64,1], index: 5, kind: input, shape index: {}]   ;;  %s661_s2 = inlined_call_operand.vmem [shape: f32[1,128], index: 2, kind: input, shape index: {}]   ;;  %s662_s6 = inlined_call_operand.<no memory space> [shape: f32[1,1], index: 6, kind: input, shape index: {}]   ;;  %s663_s4 = inlined_call_operand.vmem [shape: f32[1,64], index: 4, kind: input, shape index: {}]   ;;  %s664_s7 = inlined_call_operand.vmem [shape: f32[8,1], index: 7, kind: output, shape index: {}]  }
   0x1   :  { %430 = vmatprep.subr.bf16.mxu0 %v481_v0  ;;  %v28_v1 = vld [vmem:[%s657_s1] sm:$0xff]  ;;  %v29_v2 = vld [vmem:[%s657_s1 + $0x8] sm:$0xff]  ;;  %v30_v3 = vld [vmem:[%s657_s1 + $0x10] sm:$0xff]  ;;  %373 = vmatprep.mubr.msk.f32.mxu0 %vm482_vm0, %v483_v4  ;;  %vm71_vm2 = vcmask 580608   ;;  %v12_v57 = vstv %s662_s6  ;;  %vm233_vm3 = vcmask 523264   ;;  %vm307_vm4 = vcmask 7168  }
   0x2   :  { %v431_v5 = vpack.c.bf16 %v29_v2, %v28_v1  ;;  %v31_v6 = vld [vmem:[%s657_s1 + $0x18] sm:$0xff]  ;;  %442 = vmatprep.subr.bf16.mxu1 %v481_v0  ;;  %408 = vmatprep.mubr.msk.f32.mxu1 %vm482_vm0, %v483_v4  ;;  %v32_v8 = vld [vmem:[%s657_s1 + $0x20] sm:$0xff]  ;;  %v39_v10 = vld [vmem:[%s658_s3 + $0x8] sm:$0xff]  ;;  %13 = vst [vmem:[#allocation2] sm:$0x1] %v12_v57 }
   0x3   :  { %v434_v7 = vpack.c.bf16 %v31_v6, %v30_v3  ;;  %v38_v9 = vld [vmem:[%s658_s3] sm:$0xff]  ;;  %v33_v11 = vld [vmem:[%s657_s1 + $0x28] sm:$0xff]  ;;  %v40_v13 = vld [vmem:[%s658_s3 + $0x10] sm:$0xff] }
   0x4   :  { %432 = vmatpush3.bf16.msra.mxu0 %v431_v5  ;;  %v443_v12 = vpack.c.bf16 %v39_v10, %v38_v9  ;;  %v41_v14 = vld [vmem:[%s658_s3 + $0x18] sm:$0xff]  ;;  %v437_v16 = vpack.c.bf16 %v33_v11, %v32_v8  ;;  %v42_v17 = vld [vmem:[%s658_s3 + $0x20] sm:$0xff]  ;;  %v43_v18 = vld [vmem:[%s658_s3 + $0x28] sm:$0xff] }
   0x5   :  { %433 = vmatprep.subr.bf16.mxu0 %v481_v0  ;;  %v446_v15 = vpack.c.bf16 %v41_v14, %v40_v13  ;;  %v34_v19 = vld [vmem:[%s657_s1 + $0x30] sm:$0xff]  ;;  %v35_v20 = vld [vmem:[%s657_s1 + $0x38] sm:$0xff]  ;;  %v449_v21 = vpack.c.bf16 %v43_v18, %v42_v17  ;;  %v46_v26 = vld [vmem:[%s658_s3 + $0x40] sm:$0xff] }
   0x6   :  { %444 = vmatpush3.bf16.msra.mxu1 %v443_v12  ;;  %v440_v22 = vpack.c.bf16 %v35_v20, %v34_v19  ;;  %v44_v23 = vld [vmem:[%s658_s3 + $0x30] sm:$0xff]  ;;  %v45_v24 = vld [vmem:[%s658_s3 + $0x38] sm:$0xff]  ;;  %v47_v27 = vld [vmem:[%s658_s3 + $0x48] sm:$0xff] }
   0x7   :  { %445 = vmatprep.subr.bf16.mxu1 %v481_v0  ;;  %v452_v25 = vpack.c.bf16 %v45_v24, %v44_v23  ;;  %v36_v28 = vld [vmem:[%s657_s1 + $0x40] sm:$0x7f]  ;;  %v455_v30 = vpack.c.bf16 %v47_v27, %v46_v26  ;;  %v48_v31 = vld [vmem:[%s658_s3 + $0x50] sm:$0xff]  ;;  %v49_v32 = vld [vmem:[%s658_s3 + $0x58] sm:$0xff] }
   0x8   :  { %435 = vmatpush3.bf16.msra.mxu0 %v434_v7  ;;  %v64_v29 = vld [vmem:[%s659_s0] sm:$0xff]  ;;  %v458_v33 = vpack.c.bf16 %v49_v32, %v48_v31  ;;  %v51_v35 = vld [vmem:[%s658_s3 + $0x68] sm:$0xff]  ;;  %v52_v37 = vld [vmem:[%s658_s3 + $0x70] sm:$0xff] }
   0x9   :  { %436 = vmatprep.subr.bf16.mxu0 %v481_v0  ;;  %v50_v34 = vld [vmem:[%s658_s3 + $0x60] sm:$0xff]  ;;  %v53_v38 = vld [vmem:[%s658_s3 + $0x78] sm:$0xff]  ;;  %v56_v41 = vld [vmem:[%s660_s5 + $0x8] sm:$0xff] }
   0xa   :  { %447 = vmatpush3.bf16.msra.mxu1 %v446_v15  ;;  %v461_v36 = vpack.c.bf16 %v51_v35, %v50_v34  ;;  %v464_v39 = vpack.c.bf16 %v53_v38, %v52_v37  ;;  %v55_v40 = vld [vmem:[%s660_s5] sm:$0xff]  ;;  %v57_v42 = vld [vmem:[%s660_s5 + $0x10] sm:$0xff]  ;;  %v58_v44 = vld [vmem:[%s660_s5 + $0x18] sm:$0xff] }
   0xb   :  { %448 = vmatprep.subr.bf16.mxu1 %v481_v0  ;;  %v467_v43 = vpack.c.bf16 %v56_v41, %v55_v40  ;;  %v470_v45 = vpack.c.bf16 %v58_v44, %v57_v42  ;;  %v59_v46 = vld [vmem:[%s660_s5 + $0x20] sm:$0xff]  ;;  %v60_v47 = vld [vmem:[%s660_s5 + $0x28] sm:$0xff]  ;;  %v61_v54 = vld [vmem:[%s660_s5 + $0x30] sm:$0xff] }
   0xc   :  { %438 = vmatpush3.bf16.msra.mxu0 %v437_v16  ;;  %v473_v48 = vpack.c.bf16 %v60_v47, %v59_v46  ;;  %v313_v49 = vld [vmem:[%s661_s2] ss:$0 sm:$0xff]  ;;  %v62_v55 = vld [vmem:[%s660_s5 + $0x38] sm:$0xff] }
   0xd   :  { %439 = vmatprep.subr.bf16.mxu0 %v481_v0  ;;  %v476_v56 = vpack.c.bf16 %v62_v55, %v61_v54  ;;  %v316_v58 = vld [vmem:[%s663_s4] ss:$0 sm:$0xff] }
   0xe   :  { %450 = vmatpush3.bf16.msra.mxu1 %v449_v21  ;;  %v317_v63 = vld [vmem:[#allocation2] ss:$0 sm:$0xff] }
   0xf   :  { %451 = vmatprep.subr.bf16.mxu1 %v481_v0 }
  0x10   :  { %441 = vmatpush3.bf16.msra.mxu0 %v440_v22 }
  0x11   :  { %371 = vmatprep.subr.mxu0 %v483_v4 }
  0x12   :  { %453 = vmatpush3.bf16.msra.mxu1 %v452_v25 }
  0x13   :  { %454 = vmatprep.subr.bf16.mxu1 %v481_v0 }
  0x14   :  { %372 = vmatpush3.msk.msra.mxu0 %vm75_vm1, %v36_v28 }
  0x15   :  { %374 = vmatmul.mubr.msk.f32.vlgmr.msra.gmra.mrb[0].mxu0 %vm71_vm2, %v64_v29  ;;  %466 = vmatprep.subr.bf16.mxu0 %v481_v0 }
  0x16   :  { %427 = vmatprep.mubr.msk.f32.mxu0 %vm482_vm0, %v483_v4  ;;  %456 = vmatpush3.bf16.msra.mxu1 %v455_v30 }
  0x17   :  { %457 = vmatprep.subr.bf16.mxu1 %v481_v0  ;;  %468 = vmatpush3.bf16.msra.mxu0 %v467_v43 }
  0x18   :  { %469 = vmatprep.subr.bf16.mxu0 %v481_v0 }
  0x1a   :  { %459 = vmatpush3.bf16.msra.mxu1 %v458_v33 }
  0x1b   :  { %460 = vmatprep.subr.bf16.mxu1 %v481_v0  ;;  %471 = vmatpush3.bf16.msra.mxu0 %v470_v45 }
  0x1c   :  { %472 = vmatprep.subr.bf16.mxu0 %v481_v0 }
  0x1e   :  { %462 = vmatpush3.bf16.msra.mxu1 %v461_v36 }
  0x1f   :  { %463 = vmatprep.subr.bf16.mxu1 %v481_v0  ;;  %474 = vmatpush3.bf16.msra.mxu0 %v473_v48 }
  0x20   :  { %475 = vmatprep.subr.bf16.mxu0 %v481_v0 }
  0x22   :  { %465 = vmatpush3.bf16.msra.mxu1 %v464_v39 }
  0x23   :  { %477 = vmatpush3.bf16.msra.mxu0 %v476_v56 }
  0xe8   :  { %v145_v50 = vpop.f32.mrb[0].mxu0 }
  0xe9   :  { %v146_v51 = vadd.f32 %v313_v49, %v145_v50  ;;  %v375_v52 = vpop.f32.mrb[1].mxu0 }
  0xeb   :  { %v149_v53 = vmax.f32 %v146_v51, 0.0 }
  0xed   :  { %409 = vmatmul.mubr.f32.vlgmr.msra.gmra.mrb[0].mxu1 %v149_v53 }
 0x1c0   :  { %v222_v59 = vpop.f32.mrb[0].mxu1 }
 0x1c1   :  { %v223_v60 = vadd.f32 %v316_v58, %v222_v59  ;;  %v410_v61 = vpop.f32.mrb[1].mxu1 }
 0x1c3   :  { %v226_v62 = vmax.f32 %v223_v60, 0.0 }
 0x1c5   :  { %428 = vmatmul.mubr.msk.f32.vlgmr.msra.gmra.mrb[2].mxu0 %vm233_vm3, %v226_v62 }
 0x298   :  { %v303_v0 = vpop.f32.mrb[2].mxu0 }
 0x299   :  { %v304_v1 = vadd.f32 %v317_v63, %v303_v0  ;;  %v429_v2 = vpop.f32.mrb[3].mxu0 }
 0x29b   :  { %308 = vst.msk [vmem:[%s664_s7] sm:$0xff] %vm307_vm4, %v304_v1 }

</bundles_post_ra>
